<compile_context>
chip_gen: v6e
topology: v6e:2x2x1
jax: 0.10.0
libtpu: 0.0.40
codegen_flags: <defaults>
</compile_context>

<pallas_src>
import functools

import jax
import jax.numpy as jnp
import numpy as np
from jax.experimental import pallas as pl
from jax.experimental.pallas import tpu as pltpu

_LANES = 128


def _head_kernel(num_classes, x_ref, w_ref, b_ref, o_ref, acc_ref):
    """Global-avg-pool over spatial + Linear head.

    x_ref  : [tn, C, ts]   feature tile, native NCDHW-flattened layout (ts % 128 == 0)
    w_ref  : [C, nc]       f32, fc weight transposed, 1/S folded in
    b_ref  : [nc]          f32, SMEM
    o_ref  : [1, tn, nc]   f32 partial logits for this S-split
    acc_ref: [tn, C, 128]  f32 scratch — lane-aligned running sum over the S axis
    """
    sp = pl.program_id(0)        # S-split (multi-TensorCore) axis
    sj = pl.program_id(2)        # S-tile (reduction) axis

    @pl.when(sj == 0)
    def _init():
        acc_ref[...] = jnp.zeros_like(acc_ref)

    # Lane-aligned partial accumulation: pure VPU adds on [tn, C, 128] chunks,
    # same layout as the x tile -> no per-step XLU reduce / relayout.
    ts = x_ref.shape[-1]
    for k in range(ts // _LANES):
        acc_ref[...] += x_ref[:, :, k * _LANES:(k + 1) * _LANES].astype(jnp.float32)

    @pl.when(sj == pl.num_programs(2) - 1)
    def _finalize():
        # One cross-lane reduce per (split, N-tile), then the tiny MXU matmul.
        pooled = jnp.sum(acc_ref[...], axis=-1)                       # [tn, C]
        logits = jnp.dot(pooled, w_ref[...],
                         preferred_element_type=jnp.float32)          # [tn, nc]
        # Bias from SMEM scalars (no padded VMEM tile for 8 bytes). Add it on
        # split 0 only so summing per-split partials applies it exactly once.
        col = jax.lax.broadcasted_iota(jnp.int32, logits.shape, 1)
        bias = jnp.zeros(logits.shape, jnp.float32)
        for c in range(num_classes):                                  # static, tiny
            bias = jnp.where(col == c, b_ref[c], bias)
        bias = bias * (sp == 0).astype(jnp.float32)
        o_ref[...] = (logits + bias)[None].astype(o_ref.dtype)


def _choose_n_tile(n, cap=16):
    """Batch tile. Kept <= cap so the [tn, C, 128] f32 accumulator stays small;
    prefers tn == N or a multiple of 8 (sublane tiling on the output block)."""
    if n <= cap:
        return n
    for tn in range(cap - cap % 8, 0, -8):       # multiples of 8 dividing N
        if n % tn == 0:
            return tn
    for tn in range(cap, 0, -1):                 # pathological N: any divisor
        if n % tn == 0:
            return tn
    return 1


def _plan_s_tiles(chunks_per_split, max_chunks_per_tile):
    """Pick (chunks_per_tile, tiles_per_split) minimizing zero-padding, then
    grid steps, given a per-tile 128-lane-chunk budget."""
    cps = max(int(chunks_per_split), 1)
    hi = max(min(cps, int(max_chunks_per_tile)), 1)
    best_cpt, best_key = 1, None
    for cpt in range(hi, 0, -1):
        tiles = pl.cdiv(cps, cpt)
        key = (tiles * cpt - cps, tiles)         # (padding waste, grid steps)
        if best_key is None or key < best_key:
            best_cpt, best_key = cpt, key
        if key[0] == 0:
            break
    return best_cpt, pl.cdiv(cps, best_cpt)


def _auto_num_splits(n_parallel_steps, s_chunks):
    """2-way S split only when the N axis can't feed two TensorCores, there is
    enough spatial work, and the device looks multi-TensorCore (v7x)."""
    if n_parallel_steps >= 2 or s_chunks < 8:
        return 1
    try:
        kind = jax.devices()[0].device_kind.lower()
    except Exception:
        return 1
    return 2 if "v7" in kind else 1


def squeezenet_head(feat_ncdhw, fc_weight, fc_bias, *,
                    tile_budget_bytes=8 << 20,
                    num_splits=None,
                    cast_features_to_bf16=False):
    """feat_ncdhw: encoder last-stage feature map, [N, C, T, H, W] (torch NCDHW).
    fc_weight: [num_classes, C] (torch nn.Linear layout); fc_bias: [num_classes].
    Returns logits [N, num_classes] (f32)."""
    N, C, T, H, W = feat_ncdhw.shape
    num_classes, c_w = fc_weight.shape
    assert c_w == C, "fc weight must match feature channels"
    S = T * H * W

    # Native layout: reshape only — no transpose of the big operand.
    x = feat_ncdhw.reshape(N, C, S)
    if cast_features_to_bf16 and x.dtype == jnp.float32:
        # Only pays when this cast fuses with the producing encoder under jit;
        # standalone it is an extra HBM round trip, so it is opt-in.
        x = x.astype(jnp.bfloat16)
    itemsize = jnp.dtype(x.dtype).itemsize

    tn = _choose_n_tile(N)

    # S tiling: 128-lane chunks, largest tile within the byte budget.
    max_cpt = max(int(tile_budget_bytes) // (tn * C * _LANES * itemsize), 1)
    s_chunks = pl.cdiv(S, _LANES)
    if num_splits is None:
        num_splits = _auto_num_splits(N // tn, s_chunks)
    num_splits = max(int(num_splits), 1)

    cps = pl.cdiv(s_chunks, num_splits)                  # chunks per split
    cpt, tiles = _plan_s_tiles(cps, max_cpt)             # chunks/tile, tiles/split
    ts = cpt * _LANES
    s_pad = num_splits * tiles * ts
    if s_pad != S:
        # Zero padding does not change the sum; 1/S (true S) folded into w
        # keeps the mean exact.
        x = jnp.pad(x, ((0, 0), (0, 0), (0, s_pad - S)))

    w = jnp.transpose(fc_weight).astype(jnp.float32) / jnp.float32(S)   # [C, nc]
    b = fc_bias.astype(jnp.float32)                                     # [nc]

    grid = (num_splits, N // tn, tiles)
    s_tiles_per_split = tiles

    def x_index_map(sp, i, j):
        return (i, 0, sp * s_tiles_per_split + j)

    # Explicit scoped-VMEM limit: 2x double-buffered x tile + accumulator +
    # headroom. With the default 8 MiB tile budget this is ~20-24 MiB — inside
    # v5e's 128 MiB physical and comfortably under v7x's 64 MiB per-TC VMEM.
    tile_bytes = tn * C * ts * itemsize
    acc_bytes = tn * C * _LANES * 4
    vmem_limit = int(max(16 << 20, 2 * tile_bytes + acc_bytes + (4 << 20)))

    cost = pl.CostEstimate(
        flops=N * C * s_pad + 2 * N * C * num_classes * num_splits,
        transcendentals=0,
        bytes_accessed=(N * C * s_pad * itemsize
                        + C * num_classes * 4
                        + num_splits * N * num_classes * 4
                        + num_classes * 4),
    )

    kernel = functools.partial(_head_kernel, num_classes)

    partial_logits = pl.pallas_call(
        kernel,
        out_shape=jax.ShapeDtypeStruct((num_splits, N, num_classes), jnp.float32),
        grid_spec=pltpu.PrefetchScalarGridSpec(
            num_scalar_prefetch=0,
            grid=grid,
            in_specs=[
                pl.BlockSpec((tn, C, ts), x_index_map),
                pl.BlockSpec((C, num_classes), lambda sp, i, j: (0, 0)),
                pl.BlockSpec(memory_space=pltpu.MemorySpace.SMEM),
            ],
            out_specs=pl.BlockSpec((1, tn, num_classes),
                                   lambda sp, i, j: (sp, i, 0)),
            scratch_shapes=[pltpu.VMEM((tn, C, _LANES), jnp.float32)],
        ),
        compiler_params=pltpu.CompilerParams(
            dimension_semantics=("parallel", "parallel", "arbitrary"),
            vmem_limit_bytes=vmem_limit),
        cost_estimate=cost,
    )(x, w, b)

    if num_splits == 1:
        return partial_logits[0]
    return jnp.sum(partial_logits, axis=0)           # trivial follow-up add


if __name__ == "__main__":
    # 3D SqueezeNet last stage has 512 channels (forced by nn.Linear(512, 2)).
    N, C, num_classes = 2, 512, 2

    key = jax.random.PRNGKey(0)
    k_feat, k_feat2, k_w, k_b = jax.random.split(key, 4)

    fc_w = jax.random.normal(k_w, (num_classes, C), dtype=jnp.float32) * 0.02
    fc_b = jax.random.normal(k_b, (num_classes,), dtype=jnp.float32) * 0.02

    def ref_head(feat, w, b):
        pooled = jnp.mean(feat.astype(jnp.float32), axis=(2, 3, 4))      # [N, C]
        return pooled @ w.T + b                                          # [N, 2]

    # 1) f32 feature path (tiny spatial extent, padded to one 128-lane chunk)
    feat = jax.random.normal(k_feat, (N, C, 2, 4, 4), dtype=jnp.float32)
    logits = jax.block_until_ready(squeezenet_head(feat, fc_w, fc_b))
    np.testing.assert_allclose(np.asarray(logits),
                               np.asarray(ref_head(feat, fc_w, fc_b)),
                               rtol=1e-4, atol=1e-4)

    # 2) bf16 feature path (HBM stream stays bf16, f32 accumulation inside)
    feat_bf16 = feat.astype(jnp.bfloat16)
    logits_bf = jax.block_until_ready(squeezenet_head(feat_bf16, fc_w, fc_b))
    np.testing.assert_allclose(np.asarray(logits_bf),
                               np.asarray(ref_head(feat_bf16, fc_w, fc_b)),
                               rtol=1e-3, atol=1e-3)

    # 3) ragged spatial extent + forced 2-way S split + multi-tile S reduction
    #    (exercises zero-padding, the per-split partial-logit path, and the
    #    resident accumulator across several S grid steps)
    feat2 = jax.random.normal(k_feat2, (N, C, 3, 10, 10), dtype=jnp.float32)
    logits2 = jax.block_until_ready(
        squeezenet_head(feat2, fc_w, fc_b, tile_budget_bytes=1 << 19, num_splits=2))
    np.testing.assert_allclose(np.asarray(logits2),
                               np.asarray(ref_head(feat2, fc_w, fc_b)),
                               rtol=1e-4, atol=1e-4)

    print("KERNEL_OK")
</pallas_src>

<mosaic_0001>
module attributes {stable_mosaic.version = 11 : i64} {
  func.func @_head_kernel(%arg0: i32, %arg1: i32, %arg2: i32, %arg3: memref<2x512x128xf32, #tpu.memory_space<vmem>>, %arg4: memref<512x2xf32, #tpu.memory_space<vmem>>, %arg5: memref<2xf32, #tpu.memory_space<smem>>, %arg6: memref<1x2x2xf32, #tpu.memory_space<vmem>>, %arg7: memref<2x512x128xf32, #tpu.memory_space<vmem>>) attributes {dimension_semantics = [#tpu.dimension_semantics<parallel>, #tpu.dimension_semantics<parallel>, #tpu.dimension_semantics<arbitrary>], iteration_bounds = array<i64: 1, 1, 1>, scalar_prefetch = 0 : i64, scratch_operands = 1 : i64, tpu.core_type = #tpu.core_type<tc>, window_params = [{transform_indices = @transform_0, window_bounds = array<i64: 2, 512, 128>}, {pipeline_mode = #tpu.pipeline_mode<synchronous>, transform_indices = @transform_1, window_bounds = array<i64: 512, 2>}, {transform_indices = @transform_2, window_bounds = array<i64: 2>}, {transform_indices = @transform_3, window_bounds = array<i64: 1, 2, 2>}]} {
    %c0_i32 = arith.constant 0 : i32
    %0 = arith.cmpi eq, %arg2, %c0_i32 : i32
    %1 = arith.extui %0 : i1 to i32
    %c0_i32_0 = arith.constant 0 : i32
    %2 = arith.cmpi ne, %1, %c0_i32_0 : i32
    scf.if %2 {
      %cst = arith.constant 0.000000e+00 : f32
      %10 = vector.broadcast %cst : f32 to vector<2x512x128xf32>
      %c0_11 = arith.constant 0 : index
      %c0_12 = arith.constant 0 : index
      %c0_13 = arith.constant 0 : index
      %11 = vector.load %arg7[%c0_11, %c0_12, %c0_13] : memref<2x512x128xf32, #tpu.memory_space<vmem>>, vector<2x512x128xf32>
      tpu.vector_store %arg7[%c0_11, %c0_12, %c0_13], %10 {strides = array<i32>} : memref<2x512x128xf32, #tpu.memory_space<vmem>>, vector<2x512x128xf32>,
    } else {
    }
    %c0 = arith.constant 0 : index
    %c0_1 = arith.constant 0 : index
    %c0_2 = arith.constant 0 : index
    %3 = vector.load %arg7[%c0, %c0_1, %c0_2] : memref<2x512x128xf32, #tpu.memory_space<vmem>>, vector<2x512x128xf32>
    %c0_3 = arith.constant 0 : index
    %c0_4 = arith.constant 0 : index
    %c0_5 = arith.constant 0 : index
    %4 = vector.load %arg3[%c0_3, %c0_4, %c0_5] : memref<2x512x128xf32, #tpu.memory_space<vmem>>, vector<2x512x128xf32>
    %5 = arith.addf %3, %4 : vector<2x512x128xf32>
    %c0_6 = arith.constant 0 : index
    %c0_7 = arith.constant 0 : index
    %c0_8 = arith.constant 0 : index
    %6 = vector.load %arg7[%c0_6, %c0_7, %c0_8] : memref<2x512x128xf32, #tpu.memory_space<vmem>>, vector<2x512x128xf32>
    tpu.vector_store %arg7[%c0_6, %c0_7, %c0_8], %5 {strides = array<i32>} : memref<2x512x128xf32, #tpu.memory_space<vmem>>, vector<2x512x128xf32>,
    %c0_i32_9 = arith.constant 0 : i32
    %7 = arith.cmpi eq, %arg2, %c0_i32_9 : i32
    %8 = arith.extui %7 : i1 to i32
    %c0_i32_10 = arith.constant 0 : i32
    %9 = arith.cmpi ne, %8, %c0_i32_10 : i32
    scf.if %9 {
      %c0_11 = arith.constant 0 : index
      %c0_12 = arith.constant 0 : index
      %c0_13 = arith.constant 0 : index
      %10 = vector.load %arg7[%c0_11, %c0_12, %c0_13] : memref<2x512x128xf32, #tpu.memory_space<vmem>>, vector<2x512x128xf32>
      %cst = arith.constant dense<0.000000e+00> : vector<2x512xf32>
      %11 = vector.multi_reduction <add>, %10, %cst [2] : vector<2x512x128xf32> to vector<2x512xf32>
      %c0_14 = arith.constant 0 : index
      %c0_15 = arith.constant 0 : index
      %12 = vector.load %arg4[%c0_14, %c0_15] : memref<512x2xf32, #tpu.memory_space<vmem>>, vector<512x2xf32>
      %cst_16 = arith.constant dense<0.000000e+00> : vector<2x2xf32>
      %13 = tpu.matmul %11, %12, %cst_16 {dimension_numbers = #tpu.dot_dimension_numbers<[1], [0], [0], [1], [0, 0, 1, 1], [], []>} : vector<2x512xf32>, vector<512x2xf32>, vector<2x2xf32> -> vector<2x2xf32>
      %14 = tpu.iota {dimensions = array<i32: 1>} : vector<2x2xi32>
      %cst_17 = arith.constant 0.000000e+00 : f32
      %15 = vector.broadcast %cst_17 : f32 to vector<2x2xf32>
      %c0_i32_18 = arith.constant 0 : i32
      %16 = vector.broadcast %c0_i32_18 : i32 to vector<2x2xi32>
      %17 = arith.cmpi eq, %14, %16 : vector<2x2xi32>
      %c0_19 = arith.constant 0 : index
      %18 = memref.load %arg5[%c0_19] : memref<2xf32, #tpu.memory_space<smem>>
      %19 = vector.broadcast %18 : f32 to vector<2x2xf32>
      %20 = arith.select %17, %19, %15 : vector<2x2xi1>, vector<2x2xf32>
      %c1_i32 = arith.constant 1 : i32
      %21 = vector.broadcast %c1_i32 : i32 to vector<2x2xi32>
      %22 = arith.cmpi eq, %14, %21 : vector<2x2xi32>
      %c1 = arith.constant 1 : index
      %23 = memref.load %arg5[%c1] : memref<2xf32, #tpu.memory_space<smem>>
      %24 = vector.broadcast %23 : f32 to vector<2x2xf32>
      %25 = arith.select %22, %24, %20 : vector<2x2xi1>, vector<2x2xf32>
      %c0_i32_20 = arith.constant 0 : i32
      %26 = arith.cmpi eq, %arg0, %c0_i32_20 : i32
      %27 = arith.extui %26 : i1 to i32
      %28 = arith.sitofp %27 : i32 to f32
      %29 = vector.broadcast %28 : f32 to vector<2x2xf32>
      %30 = arith.mulf %25, %29 : vector<2x2xf32>
      %31 = arith.addf %13, %30 : vector<2x2xf32>
      %32 = vector.shape_cast %31 : vector<2x2xf32> to vector<1x2x2xf32>
      %c0_21 = arith.constant 0 : index
      %c0_22 = arith.constant 0 : index
      %c0_23 = arith.constant 0 : index
      %33 = vector.load %arg6[%c0_21, %c0_22, %c0_23] : memref<1x2x2xf32, #tpu.memory_space<vmem>>, vector<1x2x2xf32>
      tpu.vector_store %arg6[%c0_21, %c0_22, %c0_23], %32 {strides = array<i32>} : memref<1x2x2xf32, #tpu.memory_space<vmem>>, vector<1x2x2xf32>,
    } else {
    }
    return
  }
  func.func @transform_0(%arg0: i32, %arg1: i32, %arg2: i32) -> (i32, i32, i32) {
    %c1_i32 = arith.constant 1 : i32
    %0 = arith.muli %arg0, %c1_i32 : i32
    %1 = arith.addi %0, %arg2 : i32
    %c0_i32 = arith.constant 0 : i32
    %c0_i32_0 = arith.constant 0 : i32
    return %arg1, %c0_i32, %1 : i32, i32, i32
  }
  func.func @transform_1(%arg0: i32, %arg1: i32, %arg2: i32) -> (i32, i32) {
    %c0_i32 = arith.constant 0 : i32
    %c0_i32_0 = arith.constant 0 : i32
    %c0_i32_1 = arith.constant 0 : i32
    return %c0_i32, %c0_i32_0 : i32, i32
  }
  func.func @transform_2(%arg0: i32, %arg1: i32, %arg2: i32) -> i32 {
    %c0_i32 = arith.constant 0 : i32
    %c0_i32_0 = arith.constant 0 : i32
    return %c0_i32 : i32
  }
  func.func @transform_3(%arg0: i32, %arg1: i32, %arg2: i32) -> (i32, i32, i32) {
    %c0_i32 = arith.constant 0 : i32
    %c0_i32_0 = arith.constant 0 : i32
    return %arg0, %arg1, %c0_i32 : i32, i32, i32
  }
}

</mosaic_0001>

<bundles_post_ra>
// kernel: tpu_custom_call.1
= control target key start
LH: loop header
LB: loop body
LE: loop exit
PB: predicated region body
PF: predicated region fallthrough
CT: control target
= control target key end

     0   :  { %8 = vsyncpa [#allocation4], 0  ;;  %s2933_s0 = inlined_call_operand.hbm [shape: f32[2,512,128], index: 0, kind: input, shape index: {}]   ;;  %s2934_s1 = inlined_call_operand.vmem [shape: f32[512,2], index: 1, kind: input, shape index: {}]   ;;  %s2935_s2 = inlined_call_operand.vmem [shape: f32[2], index: 2, kind: input, shape index: {}]   ;;  %s2936_s3 = inlined_call_operand.hbm [shape: f32[1,2,2], index: 3, kind: output, shape index: {}]  }
   0x1   :  { %9 = vsyncpa [#allocation6], 0 }
   0x2   :  { %10 = vsyncpa [#allocation5], 0  ;;  %s2247_s12 = smov [#allocation3]   ;;  %s34_s16 = sshll.u32 %s2935_s2, 4  ;;  %s35_s16 = int_to_ptr.vmem [resolvable:$true] %s34_s16 }
   0x3   :  { %s19_s13 = sshll.u32 %s2247_s12, 4  ;;  %s20_s13 = int_to_ptr.vmem [resolvable:$true] %s19_s13 }
   0x4   :  { %s2197_s17 = scalar_lea.vmem %s20_s13, 16384  ;;  %p2202_p1 = scmp.lt.s32.totalorder %s20_s13, %s20_s13 }
   0x5   :  { %p2198_p0 = scmp.ne.s32.totalorder %s20_s13, %s2197_s17  ;;  %p2203_p2 = scmp.lt.s32.totalorder %s2197_s17, %s2197_s17 }
   0x7   :  { %p2204_p3 = por %p2203_p2, %p2202_p1 }
   0x9   :  { %p2205_p4 = pnand %p2204_p3, %p2198_p0 }
   0xb   :  { %2208 = shalt.err (!%p2205_p4)
}
   0xc   :  { %s2248_s18 = smov 128   ;;  %s2249_s19 = smov 8  }
   0xd   :  { %25 = dma.hbm_to_vmem [thread:$0]  %s2933_s0, 16384, %s20_s13, [#allocation4], %s2248_s18, %s2248_s18, %s2249_s19  }
   0xe   :  { %s2209_s22 = scalar_lea.vmem %s35_s16, 16  ;;  %p2214_p6 = scmp.lt.s32.totalorder %s35_s16, %s35_s16 }
   0xf   :  { %p2210_p5 = scmp.ne.s32.totalorder %s35_s16, %s2209_s22  ;;  %p2215_p7 = scmp.lt.s32.totalorder %s2209_s22, %s2209_s22 }
  0x11   :  { %p2216_p8 = por %p2215_p7, %p2214_p6 }
  0x13   :  { %p2217_p9 = pnand %p2216_p8, %p2210_p5 }
  0x15   :  { %2220 = shalt.err (!%p2217_p9)
}
  0x16   :  { %s2250_s2 = smov [#allocation7]  }
  0x17   :  { %37 = dma.vmem_to_smem %s35_s16, 16, %s2250_s2, [#allocation6]  }
  0x18   :  { %2241 = dma.done.wait [#allocation4], 16384  }
  0x19   :  { %2242 = vsyncadd [#allocation4], 4294950912 }
  0x1a   :  { %2243 = dma.done.wait [#allocation6], 16  }
  0x1b   :  { %2244 = vsyncadd [#allocation6], 4294967280 }
  0x1c   :  { %44 = sfence }
  0x1d   :  { %v386_v0 = vld [vmem:[#allocation3 + $0x280] sm:$0xff]  ;;  %v387_v2 = vld [vmem:[#allocation3 + $0x288] sm:$0xff]  ;;  %v324_v7 = vld [vmem:[#allocation3 + $0x90] sm:$0xff]  ;;  %vm1293_vm0 = vcmask 130112   ;;  %vm1300_vm1 = vcmask 195712   ;;  %vm1307_vm2 = vcmask 261312  }
  0x1e   :  { %v322_v1 = vld [vmem:[#allocation3 + $0x80] sm:$0xff]  ;;  %981 = vadd.xlane.f32.xlu1 %v386_v0  ;;  %v323_v3 = vld [vmem:[#allocation3 + $0x88] sm:$0xff]  ;;  %v388_v8 = vld [vmem:[#allocation3 + $0x290] sm:$0xff]  ;;  %vm1314_vm3 = vcmask 326912   ;;  %vm1321_vm4 = vcmask 392512   ;;  %vm1328_vm5 = vcmask 458112  }
  0x1f   :  { %853 = vadd.xlane.f32.xlu0 %v322_v1  ;;  %v307_v4 = vld [vmem:[#allocation3 + $0x8] sm:$0xff]  ;;  %v306_v5 = vld [vmem:[#allocation3] sm:$0xff]  ;;  %v325_v10 = vld [vmem:[#allocation3 + $0x98] sm:$0xff]  ;;  %vm1335_vm6 = vcmask 523712   ;;  %vm1342_vm7 = vcmask 589312   ;;  %vm1349_vm8 = vcmask 654912  }
  0x20   :  { %v370_v6 = vld [vmem:[#allocation3 + $0x200] sm:$0xff]  ;;  %v371_v9 = vld [vmem:[#allocation3 + $0x208] sm:$0xff]  ;;  %v308_v11 = vld [vmem:[#allocation3 + $0x10] sm:$0xff]  ;;  %vm1356_vm9 = vcmask 720512   ;;  %vm1363_vm10 = vcmask 786112   ;;  %vm1370_vm11 = vcmask 851712  }
  0x21   :  { %v355_v12 = vld [vmem:[#allocation3 + $0x188] sm:$0xff]  ;;  %v354_v13 = vld [vmem:[#allocation3 + $0x180] sm:$0xff]  ;;  %v389_v14 = vld [vmem:[#allocation3 + $0x298] sm:$0xff]  ;;  %vm1377_vm12 = vcmask 917312   ;;  %vm1384_vm13 = vcmask 982912   ;;  %vm1391_vm14 = vcmask 1048512  }
  0x22   :  { %983 = vadd.xlane.f32.xlu1 %v387_v2  ;;  %v372_v15 = vld [vmem:[#allocation3 + $0x210] sm:$0xff]  ;;  %v419_v16 = vld [vmem:[#allocation3 + $0x388] sm:$0xff]  ;;  %v418_v17 = vld [vmem:[#allocation3 + $0x380] sm:$0xff]  ;;  %v1141_v2 = vlaneseq  ;;  %vm1946_vm15 = vcmask 1041409   ;;  %s2113_s7 = sld [smem:[#allocation7 + $0x1]]  ;;  %s2251_s8 = smov [#allocation8]  }
  0x23   :  { %855 = vadd.xlane.f32.xlu0 %v323_v3  ;;  %v326_v18 = vld [vmem:[#allocation3 + $0xa0] sm:$0xff]  ;;  %v309_v19 = vld [vmem:[#allocation3 + $0x18] sm:$0xff]  ;;  %v339_v20 = vld [vmem:[#allocation3 + $0x108] sm:$0xff]  ;;  %s2103_s9 = sshll.u32 %s2251_s8, 4  ;;  %s2104_s9 = int_to_ptr.vmem [resolvable:$true] %s2103_s9 }
  0x24   :  { %v338_v21 = vld [vmem:[#allocation3 + $0x100] sm:$0xff]  ;;  %v373_v22 = vld [vmem:[#allocation3 + $0x218] sm:$0xff]  ;;  %v356_v23 = vld [vmem:[#allocation3 + $0x190] sm:$0xff]  ;;  %s2221_s10 = scalar_lea.vmem %s2104_s9, 32  ;;  %p2226_p11 = scmp.lt.s32.totalorder %s2104_s9, %s2104_s9 }
  0x25   :  { %v402_v24 = vld [vmem:[#allocation3 + $0x300] sm:$0xff]  ;;  %v420_v26 = vld [vmem:[#allocation3 + $0x390] sm:$0xff]  ;;  %v403_v27 = vld [vmem:[#allocation3 + $0x308] sm:$0xff]  ;;  %p2222_p10 = scmp.ne.s32.totalorder %s2104_s9, %s2221_s10  ;;  %p2227_p12 = scmp.lt.s32.totalorder %s2221_s10, %s2221_s10 }
  0x26   :  { %823 = vadd.xlane.f32.xlu1 %v307_v4  ;;  %v390_v25 = vld [vmem:[#allocation3 + $0x2a0] sm:$0xff]  ;;  %v327_v28 = vld [vmem:[#allocation3 + $0xa8] sm:$0xff]  ;;  %v357_v30 = vld [vmem:[#allocation3 + $0x198] sm:$0xff] }
  0x27   :  { %821 = vadd.xlane.f32.xlu0 %v306_v5  ;;  %v310_v29 = vld [vmem:[#allocation3 + $0x20] sm:$0xff]  ;;  %v340_v31 = vld [vmem:[#allocation3 + $0x110] sm:$0xff]  ;;  %v391_v32 = vld [vmem:[#allocation3 + $0x2a8] sm:$0xff]  ;;  %v2278_v5 = vand.u32 127, %v1141_v2  ;;  %p2228_p13 = por %p2227_p12, %p2226_p11 }
  0x28   :  { %v374_v33 = vld [vmem:[#allocation3 + $0x220] sm:$0xff]  ;;  %v421_v34 = vld [vmem:[#allocation3 + $0x398] sm:$0xff]  ;;  %v404_v35 = vld [vmem:[#allocation3 + $0x310] sm:$0xff] }
  0x29   :  { %v328_v36 = vld [vmem:[#allocation3 + $0xb0] sm:$0xff]  ;;  %v311_v37 = vld [vmem:[#allocation3 + $0x28] sm:$0xff]  ;;  %v358_v38 = vld [vmem:[#allocation3 + $0x1a0] sm:$0xff]  ;;  %p2229_p0 = pnand %p2228_p13, %p2222_p10 }
  0x2a   :  { %949 = vadd.xlane.f32.xlu1 %v370_v6  ;;  %v341_v39 = vld [vmem:[#allocation3 + $0x118] sm:$0xff]  ;;  %v392_v40 = vld [vmem:[#allocation3 + $0x2b0] sm:$0xff]  ;;  %v375_v41 = vld [vmem:[#allocation3 + $0x228] sm:$0xff] }
  0x2b   :  { %857 = vadd.xlane.f32.xlu0 %v324_v7  ;;  %v422_v42 = vld [vmem:[#allocation3 + $0x3a0] sm:$0xff]  ;;  %v405_v43 = vld [vmem:[#allocation3 + $0x318] sm:$0xff]  ;;  %v312_v45 = vld [vmem:[#allocation3 + $0x30] sm:$0xff] }
  0x2c   :  { %v329_v44 = vld [vmem:[#allocation3 + $0xb8] sm:$0xff]  ;;  %v359_v46 = vld [vmem:[#allocation3 + $0x1a8] sm:$0xff]  ;;  %v342_v47 = vld [vmem:[#allocation3 + $0x120] sm:$0xff] }
  0x2d   :  { %v393_v48 = vld [vmem:[#allocation3 + $0x2b8] sm:$0xff]  ;;  %v376_v49 = vld [vmem:[#allocation3 + $0x230] sm:$0xff]  ;;  %v423_v50 = vld [vmem:[#allocation3 + $0x3a8] sm:$0xff] }
  0x2e   :  { %985 = vadd.xlane.f32.xlu1 %v388_v8  ;;  %v406_v51 = vld [vmem:[#allocation3 + $0x320] sm:$0xff]  ;;  %v313_v53 = vld [vmem:[#allocation3 + $0x38] sm:$0xff]  ;;  %v360_v54 = vld [vmem:[#allocation3 + $0x1b0] sm:$0xff]  ;;  %v2280_v8 = vshrl.u32 %v1141_v2, 7 }
  0x2f   :  { %951 = vadd.xlane.f32.xlu0 %v371_v9  ;;  %v330_v52 = vld [vmem:[#allocation3 + $0xc0] sm:$0xff]  ;;  %v343_v55 = vld [vmem:[#allocation3 + $0x128] sm:$0xff]  ;;  %v377_v57 = vld [vmem:[#allocation3 + $0x238] sm:$0xff]  ;;  %v1288_v9 = vadd.s32 4294967288, %v2278_v5 }
  0x30   :  { %v394_v56 = vld [vmem:[#allocation3 + $0x2c0] sm:$0xff]  ;;  %v424_v58 = vld [vmem:[#allocation3 + $0x3b0] sm:$0xff]  ;;  %v407_v59 = vld [vmem:[#allocation3 + $0x328] sm:$0xff] }
  0x31   :  { %v331_v60 = vld [vmem:[#allocation3 + $0xc8] sm:$0xff]  ;;  %v314_v61 = vld [vmem:[#allocation3 + $0x40] sm:$0xff]  ;;  %v361_v62 = vld [vmem:[#allocation3 + $0x1b8] sm:$0xff] }
  0x32   :  { %859 = vadd.xlane.f32.xlu1 %v325_v10  ;;  %v344_v63 = vld [vmem:[#allocation3 + $0x130] sm:$0xff]  ;;  %v395_v0 = vld [vmem:[#allocation3 + $0x2c8] sm:$0xff]  ;;  %v378_v1 = vld [vmem:[#allocation3 + $0x240] sm:$0xff] }
  0x33   :  { %825 = vadd.xlane.f32.xlu0 %v308_v11  ;;  %v425_v3 = vld [vmem:[#allocation3 + $0x3b8] sm:$0xff]  ;;  %v408_v4 = vld [vmem:[#allocation3 + $0x330] sm:$0xff]  ;;  %v315_v7 = vld [vmem:[#allocation3 + $0x48] sm:$0xff] }
  0x34   :  { %v332_v6 = vld [vmem:[#allocation3 + $0xd0] sm:$0xff] }
  0x36   :  { %919 = vadd.xlane.f32.xlu1 %v355_v12  ;;  %v362_v12 = vld [vmem:[#allocation3 + $0x1c0] sm:$0xff] }
  0x37   :  { %917 = vadd.xlane.f32.xlu0 %v354_v13  ;;  %v345_v13 = vld [vmem:[#allocation3 + $0x138] sm:$0xff] }
  0x3a   :  { %987 = vadd.xlane.f32.xlu1 %v389_v14  ;;  %v2285_v14 = vsub.s32 %v2278_v5, %v2280_v8 }
  0x3b   :  { %953 = vadd.xlane.f32.xlu0 %v372_v15  ;;  %v2288_v15 = vsub.s32 %v1288_v9, %v2280_v8 }
  0x3e   :  { %1047 = vadd.xlane.f32.xlu1 %v419_v16 }
  0x3f   :  { %1045 = vadd.xlane.f32.xlu0 %v418_v17 }
  0x42   :  { %861 = vadd.xlane.f32.xlu1 %v326_v18  ;;  %v396_v18 = vld [vmem:[#allocation3 + $0x2d0] sm:$0xff] }
  0x43   :  { %827 = vadd.xlane.f32.xlu0 %v309_v19  ;;  %v379_v19 = vld [vmem:[#allocation3 + $0x248] sm:$0xff] }
  0x46   :  { %887 = vadd.xlane.f32.xlu1 %v339_v20  ;;  %v1295_v20 = vadd.s32 4294967280, %v2278_v5 }
  0x47   :  { %885 = vadd.xlane.f32.xlu0 %v338_v21 }
  0x4a   :  { %955 = vadd.xlane.f32.xlu1 %v373_v22 }
  0x4b   :  { %921 = vadd.xlane.f32.xlu0 %v356_v23 }
  0x4e   :  { %1013 = vadd.xlane.f32.xlu1 %v402_v24 }
  0x4f   :  { %989 = vadd.xlane.f32.xlu0 %v390_v25 }
  0x52   :  { %1049 = vadd.xlane.f32.xlu1 %v420_v26 }
  0x53   :  { %1015 = vadd.xlane.f32.xlu0 %v403_v27 }
  0x56   :  { %863 = vadd.xlane.f32.xlu1 %v327_v28 }
  0x57   :  { %829 = vadd.xlane.f32.xlu0 %v310_v29  ;;  %v426_v29 = vld [vmem:[#allocation3 + $0x3c0] sm:$0xff] }
  0x5a   :  { %923 = vadd.xlane.f32.xlu1 %v357_v30  ;;  %v409_v30 = vld [vmem:[#allocation3 + $0x338] sm:$0xff] }
  0x5b   :  { %889 = vadd.xlane.f32.xlu0 %v340_v31 }
  0x5e   :  { %991 = vadd.xlane.f32.xlu1 %v391_v32 }
  0x5f   :  { %957 = vadd.xlane.f32.xlu0 %v374_v33  ;;  %v2300_v33 = vsub.s32 %v1295_v20, %v2280_v8 }
  0x62   :  { %1051 = vadd.xlane.f32.xlu1 %v421_v34 }
  0x63   :  { %1017 = vadd.xlane.f32.xlu0 %v404_v35 }
  0x66   :  { %865 = vadd.xlane.f32.xlu1 %v328_v36 }
  0x67   :  { %831 = vadd.xlane.f32.xlu0 %v311_v37  ;;  %v333_v37 = vld [vmem:[#allocation3 + $0xd8] sm:$0xff] }
  0x6a   :  { %925 = vadd.xlane.f32.xlu1 %v358_v38  ;;  %v316_v38 = vld [vmem:[#allocation3 + $0x50] sm:$0xff] }
  0x6b   :  { %891 = vadd.xlane.f32.xlu0 %v341_v39 }
  0x6e   :  { %993 = vadd.xlane.f32.xlu1 %v392_v40  ;;  %v1302_v40 = vadd.s32 4294967272, %v2278_v5 }
  0x6f   :  { %959 = vadd.xlane.f32.xlu0 %v375_v41 }
  0x72   :  { %1053 = vadd.xlane.f32.xlu1 %v422_v42 }
  0x73   :  { %1019 = vadd.xlane.f32.xlu0 %v405_v43 }
  0x76   :  { %867 = vadd.xlane.f32.xlu1 %v329_v44  ;;  %v363_v44 = vld [vmem:[#allocation3 + $0x1c8] sm:$0xff] }
  0x77   :  { %833 = vadd.xlane.f32.xlu0 %v312_v45  ;;  %v346_v45 = vld [vmem:[#allocation3 + $0x140] sm:$0xff] }
  0x7a   :  { %927 = vadd.xlane.f32.xlu1 %v359_v46 }
  0x7b   :  { %893 = vadd.xlane.f32.xlu0 %v342_v47 }
  0x7e   :  { %995 = vadd.xlane.f32.xlu1 %v393_v48 }
  0x7f   :  { %961 = vadd.xlane.f32.xlu0 %v376_v49  ;;  %v2310_v49 = vsub.s32 %v1302_v40, %v2280_v8 }
  0x82   :  { %1055 = vadd.xlane.f32.xlu1 %v423_v50 }
  0x83   :  { %1021 = vadd.xlane.f32.xlu0 %v406_v51 }
  0x86   :  { %869 = vadd.xlane.f32.xlu1 %v330_v52 }
  0x87   :  { %835 = vadd.xlane.f32.xlu0 %v313_v53 }
  0x8a   :  { %929 = vadd.xlane.f32.xlu1 %v360_v54  ;;  %v397_v54 = vld [vmem:[#allocation3 + $0x2d8] sm:$0xff] }
  0x8b   :  { %895 = vadd.xlane.f32.xlu0 %v343_v55  ;;  %v380_v55 = vld [vmem:[#allocation3 + $0x250] sm:$0xff] }
  0x8e   :  { %997 = vadd.xlane.f32.xlu1 %v394_v56 }
  0x8f   :  { %963 = vadd.xlane.f32.xlu0 %v377_v57 }
  0x92   :  { %1057 = vadd.xlane.f32.xlu1 %v424_v58 }
  0x93   :  { %1023 = vadd.xlane.f32.xlu0 %v407_v59 }
  0x96   :  { %871 = vadd.xlane.f32.xlu1 %v331_v60 }
  0x97   :  { %837 = vadd.xlane.f32.xlu0 %v314_v61 }
  0x9a   :  { %931 = vadd.xlane.f32.xlu1 %v361_v62  ;;  %v427_v62 = vld [vmem:[#allocation3 + $0x3c8] sm:$0xff] }
  0x9b   :  { %897 = vadd.xlane.f32.xlu0 %v344_v63  ;;  %v410_v63 = vld [vmem:[#allocation3 + $0x340] sm:$0xff] }
  0x9e   :  { %999 = vadd.xlane.f32.xlu1 %v395_v0 }
  0x9f   :  { %965 = vadd.xlane.f32.xlu0 %v378_v1 }
  0xa2   :  { %1059 = vadd.xlane.f32.xlu1 %v425_v3 }
  0xa3   :  { %1025 = vadd.xlane.f32.xlu0 %v408_v4 }
  0xa6   :  { %873 = vadd.xlane.f32.xlu1 %v332_v6  ;;  %v334_v6 = vld [vmem:[#allocation3 + $0xe0] sm:$0xff] }
  0xa7   :  { %839 = vadd.xlane.f32.xlu0 %v315_v7  ;;  %v982_v10 = vpop.xlane.xlu1 %981  ;;  %v317_v7 = vld [vmem:[#allocation3 + $0x58] sm:$0xff] }
  0xa8   :  { %v854_v11 = vpop.xlane.xlu0 %853  ;;  %v1712_v21 = vrot.slane %v982_v10, %v2285_v14 }
  0xa9   :  { %v1396_v22 = vrot.slane %v854_v11, %v2285_v14  ;;  %v1309_v11 = vadd.s32 4294967264, %v2278_v5 }
  0xaa   :  { %933 = vadd.xlane.f32.xlu1 %v362_v12 }
  0xab   :  { %899 = vadd.xlane.f32.xlu0 %v345_v13  ;;  %v984_v16 = vpop.xlane.xlu1 %983 }
  0xac   :  { %v856_v17 = vpop.xlane.xlu0 %855  ;;  %v1716_v23 = vrot.slane %v984_v16, %v2288_v15 }
  0xad   :  { %v1400_v24 = vrot.slane %v856_v17, %v2288_v15 }
  0xae   :  { %v1717_v25 = vsel %vm1293_vm0, %v1716_v23, %v1712_v21  ;;  %1001 = vadd.xlane.f32.xlu1 %v396_v18  ;;  %v364_v18 = vld [vmem:[#allocation3 + $0x1d0] sm:$0xff] }
  0xaf   :  { %v1401_v26 = vsel %vm1293_vm0, %v1400_v24, %v1396_v22  ;;  %967 = vadd.xlane.f32.xlu0 %v379_v19  ;;  %v824_v27 = vpop.xlane.xlu1 %823  ;;  %v347_v19 = vld [vmem:[#allocation3 + $0x148] sm:$0xff]  ;;  %v2329_v22 = vsub.s32 %v1309_v11, %v2280_v8 }
  0xb0   :  { %v822_v28 = vpop.xlane.xlu0 %821  ;;  %v1292_v31 = vrot.slane %v824_v27, %v2288_v15  ;;  %v381_v27 = vld [vmem:[#allocation3 + $0x258] sm:$0xff] }
  0xb1   :  { %v1287_v32 = vrot.slane %v822_v28, %v2285_v14 }
  0xb2   :  { %1061 = vadd.xlane.f32.xlu1 %v426_v29 }
  0xb3   :  { %v1294_v34 = vsel %vm1293_vm0, %v1292_v31, %v1287_v32  ;;  %1027 = vadd.xlane.f32.xlu0 %v409_v30  ;;  %v950_v35 = vpop.xlane.xlu1 %949 }
  0xb4   :  { %v858_v36 = vpop.xlane.xlu0 %857  ;;  %v1633_v46 = vrot.slane %v950_v35, %v2285_v14  ;;  %v428_v35 = vld [vmem:[#allocation3 + $0x3d0] sm:$0xff] }
  0xb5   :  { %v1405_v39 = vrot.slane %v858_v36, %v2300_v33  ;;  %v411_v36 = vld [vmem:[#allocation3 + $0x348] sm:$0xff] }
  0xb6   :  { %875 = vadd.xlane.f32.xlu1 %v333_v37 }
  0xb7   :  { %v1406_v41 = vsel %vm1300_vm1, %v1405_v39, %v1401_v26  ;;  %841 = vadd.xlane.f32.xlu0 %v316_v38  ;;  %v986_v42 = vpop.xlane.xlu1 %985  ;;  %v398_v26 = vld [vmem:[#allocation3 + $0x2e0] sm:$0xff] }
  0xb8   :  { %v952_v43 = vpop.xlane.xlu0 %951  ;;  %v1721_v47 = vrot.slane %v986_v42, %v2300_v33  ;;  %v335_v42 = vld [vmem:[#allocation3 + $0xe8] sm:$0xff] }
  0xb9   :  { %v1637_v48 = vrot.slane %v952_v43, %v2288_v15  ;;  %v318_v43 = vld [vmem:[#allocation3 + $0x60] sm:$0xff] }
  0xba   :  { %v1722_v50 = vsel %vm1300_vm1, %v1721_v47, %v1717_v25  ;;  %935 = vadd.xlane.f32.xlu1 %v363_v44 }
  0xbb   :  { %v1638_v51 = vsel %vm1293_vm0, %v1637_v48, %v1633_v46  ;;  %901 = vadd.xlane.f32.xlu0 %v346_v45  ;;  %v860_v52 = vpop.xlane.xlu1 %859 }
  0xbc   :  { %v826_v53 = vpop.xlane.xlu0 %825  ;;  %v1410_v56 = vrot.slane %v860_v52, %v2310_v49  ;;  %v348_v52 = vld [vmem:[#allocation3 + $0x150] sm:$0xff] }
  0xbd   :  { %v1299_v57 = vrot.slane %v826_v53, %v2300_v33 }
  0xbe   :  { %v1411_v58 = vsel %vm1307_vm2, %v1410_v56, %v1406_v41  ;;  %1003 = vadd.xlane.f32.xlu1 %v397_v54  ;;  %v1316_v54 = vadd.s32 4294967256, %v2278_v5 }
  0xbf   :  { %v1301_v59 = vsel %vm1300_vm1, %v1299_v57, %v1294_v34  ;;  %969 = vadd.xlane.f32.xlu0 %v380_v55  ;;  %v920_v60 = vpop.xlane.xlu1 %919 }
  0xc0   :  { %v918_v61 = vpop.xlane.xlu0 %917  ;;  %v1558_v0 = vrot.slane %v920_v60, %v2288_v15 }
  0xc1   :  { %v1554_v1 = vrot.slane %v918_v61, %v2285_v14 }
  0xc2   :  { %1063 = vadd.xlane.f32.xlu1 %v427_v62 }
  0xc3   :  { %v1559_v2 = vsel %vm1293_vm0, %v1558_v0, %v1554_v1  ;;  %1029 = vadd.xlane.f32.xlu0 %v410_v63  ;;  %v988_v3 = vpop.xlane.xlu1 %987  ;;  %v2350_v63 = vsub.s32 %v1316_v54, %v2280_v8 }
  0xc4   :  { %v954_v4 = vpop.xlane.xlu0 %953  ;;  %v1726_v9 = vrot.slane %v988_v3, %v2310_v49 }
  0xc5   :  { %v1642_v10 = vrot.slane %v954_v4, %v2300_v33  ;;  %v429_v4 = vld [vmem:[#allocation3 + $0x3d8] sm:$0xff] }
  0xc6   :  { %v1727_v12 = vsel %vm1307_vm2, %v1726_v9, %v1722_v50  ;;  %877 = vadd.xlane.f32.xlu1 %v334_v6  ;;  %v412_v6 = vld [vmem:[#allocation3 + $0x350] sm:$0xff] }
  0xc7   :  { %v1643_v13 = vsel %vm1300_vm1, %v1642_v10, %v1638_v51  ;;  %843 = vadd.xlane.f32.xlu0 %v317_v7  ;;  %v1048_v16 = vpop.xlane.xlu1 %1047  ;;  %v365_v51 = vld [vmem:[#allocation3 + $0x1d8] sm:$0xff] }
  0xc8   :  { %v1046_v17 = vpop.xlane.xlu0 %1045  ;;  %v1874_v20 = vrot.slane %v1048_v16, %v2288_v15 }
  0xc9   :  { %v1870_v21 = vrot.slane %v1046_v17, %v2285_v14 }
  0xca   :  { %937 = vadd.xlane.f32.xlu1 %v364_v18 }
  0xcb   :  { %v1875_v23 = vsel %vm1293_vm0, %v1874_v20, %v1870_v21  ;;  %903 = vadd.xlane.f32.xlu0 %v347_v19  ;;  %v862_v24 = vpop.xlane.xlu1 %861 }
  0xcc   :  { %v828_v25 = vpop.xlane.xlu0 %827  ;;  %v1415_v28 = vrot.slane %v862_v24, %v2329_v22  ;;  %v349_v24 = vld [vmem:[#allocation3 + $0x158] sm:$0xff] }
  0xcd   :  { %v1306_v29 = vrot.slane %v828_v25, %v2310_v49 }
  0xce   :  { %v1416_v30 = vsel %vm1314_vm3, %v1415_v28, %v1411_v58  ;;  %1005 = vadd.xlane.f32.xlu1 %v398_v26  ;;  %v399_v58 = vld [vmem:[#allocation3 + $0x2e8] sm:$0xff] }
  0xcf   :  { %v1308_v31 = vsel %vm1307_vm2, %v1306_v29, %v1301_v59  ;;  %971 = vadd.xlane.f32.xlu0 %v381_v27  ;;  %v888_v32 = vpop.xlane.xlu1 %887  ;;  %v382_v59 = vld [vmem:[#allocation3 + $0x260] sm:$0xff]  ;;  %v1323_v27 = vadd.s32 4294967248, %v2278_v5 }
  0xd0   :  { %v886_v34 = vpop.xlane.xlu0 %885  ;;  %v1479_v37 = vrot.slane %v888_v32, %v2288_v15  ;;  %v400_v32 = vld [vmem:[#allocation3 + $0x2f0] sm:$0xff] }
  0xd1   :  { %v1475_v38 = vrot.slane %v886_v34, %v2285_v14  ;;  %v383_v34 = vld [vmem:[#allocation3 + $0x268] sm:$0xff] }
  0xd2   :  { %1065 = vadd.xlane.f32.xlu1 %v428_v35 }
  0xd3   :  { %v1480_v39 = vsel %vm1293_vm0, %v1479_v37, %v1475_v38  ;;  %1031 = vadd.xlane.f32.xlu0 %v411_v36  ;;  %v956_v40 = vpop.xlane.xlu1 %955  ;;  %v2370_v37 = vsub.s32 %v1323_v27, %v2280_v8  ;;  %v1104_v27 = vld [vmem:[%s2934_s1 + $0xd8] sm:$0xff] }
  0xd4   :  { %v922_v41 = vpop.xlane.xlu0 %921  ;;  %v1647_v44 = vrot.slane %v956_v40, %v2310_v49 }
  0xd5   :  { %v1563_v45 = vrot.slane %v922_v41, %v2300_v33 }
  0xd6   :  { %v1648_v46 = vsel %vm1307_vm2, %v1647_v44, %v1643_v13  ;;  %879 = vadd.xlane.f32.xlu1 %v335_v42  ;;  %v319_v13 = vld [vmem:[#allocation3 + $0x68] sm:$0xff]  ;;  %v430_v42 = vld [vmem:[#allocation3 + $0x3e0] sm:$0xff] }
  0xd7   :  { %v1564_v47 = vsel %vm1300_vm1, %v1563_v45, %v1559_v2  ;;  %845 = vadd.xlane.f32.xlu0 %v318_v43  ;;  %v1014_v48 = vpop.xlane.xlu1 %1013  ;;  %v413_v43 = vld [vmem:[#allocation3 + $0x358] sm:$0xff] }
  0xd8   :  { %v990_v50 = vpop.xlane.xlu0 %989  ;;  %v1791_v60 = vrot.slane %v1014_v48, %v2285_v14 }
  0xd9   :  { %v1731_v53 = vrot.slane %v990_v50, %v2329_v22  ;;  %v337_v50 = vld [vmem:[#allocation3 + $0xf8] sm:$0xff] }
  0xda   :  { %939 = vadd.xlane.f32.xlu1 %v365_v51  ;;  %v320_v51 = vld [vmem:[#allocation3 + $0x70] sm:$0xff] }
  0xdb   :  { %v1732_v55 = vsel %vm1314_vm3, %v1731_v53, %v1727_v12  ;;  %905 = vadd.xlane.f32.xlu0 %v348_v52  ;;  %v1050_v56 = vpop.xlane.xlu1 %1049  ;;  %v336_v12 = vld [vmem:[#allocation3 + $0xf0] sm:$0xff] }
  0xdc   :  { %v1016_v57 = vpop.xlane.xlu0 %1015  ;;  %v1879_v61 = vrot.slane %v1050_v56, %v2300_v33 }
  0xdd   :  { %v1795_v62 = vrot.slane %v1016_v57, %v2288_v15 }
  0xde   :  { %v1880_v0 = vsel %vm1300_vm1, %v1879_v61, %v1875_v23  ;;  %1007 = vadd.xlane.f32.xlu1 %v399_v58  ;;  %v366_v23 = vld [vmem:[#allocation3 + $0x1e0] sm:$0xff]  ;;  %v367_v58 = vld [vmem:[#allocation3 + $0x1e8] sm:$0xff] }
  0xdf   :  { %v1796_v1 = vsel %vm1293_vm0, %v1795_v62, %v1791_v60  ;;  %973 = vadd.xlane.f32.xlu0 %v382_v59  ;;  %v864_v2 = vpop.xlane.xlu1 %863  ;;  %v350_v59 = vld [vmem:[#allocation3 + $0x160] sm:$0xff]  ;;  %v1108_v60 = vld [vmem:[%s2934_s1 + $0xf8] sm:$0xff]  ;;  %vm1143_vm0 = vcmp.eq.s32.totalorder %v2278_v5, 0 }
  0xe0   :  { %v830_v3 = vpop.xlane.xlu0 %829  ;;  %v1420_v14 = vrot.slane %v864_v2, %v2350_v63  ;;  %2114 = vmatprep.subr.mxu0 %v1108_v60  ;;  %v1107_v2 = vld [vmem:[%s2934_s1 + $0xf0] sm:$0xff] }
  0xe1   :  { %v1313_v7 = vrot.slane %v830_v3, %v2329_v22  ;;  %v1123_v60 = vld [vmem:[%s2934_s1 + $0x170] sm:$0xff] }
  0xe2   :  { %v1421_v15 = vsel %vm1321_vm4, %v1420_v14, %v1416_v30  ;;  %1067 = vadd.xlane.f32.xlu1 %v429_v4 }
  0xe3   :  { %v1315_v9 = vsel %vm1314_vm3, %v1313_v7, %v1308_v31  ;;  %1033 = vadd.xlane.f32.xlu0 %v412_v6  ;;  %v924_v10 = vpop.xlane.xlu1 %923  ;;  %v1091_v6 = vld [vmem:[%s2934_s1 + $0x70] sm:$0xff] }
  0xe4   :  { %v890_v11 = vpop.xlane.xlu0 %889  ;;  %v1568_v16 = vrot.slane %v924_v10, %v2310_v49  ;;  %v1106_v10 = vld [vmem:[%s2934_s1 + $0xe8] sm:$0xff] }
  0xe5   :  { %v1484_v17 = vrot.slane %v890_v11, %v2300_v33 }
  0xe6   :  { %v1569_v18 = vsel %vm1307_vm2, %v1568_v16, %v1564_v47  ;;  %881 = vadd.xlane.f32.xlu1 %v336_v12  ;;  %v1090_v16 = vld [vmem:[%s2934_s1 + $0x68] sm:$0xff] }
  0xe7   :  { %v1485_v19 = vsel %vm1300_vm1, %v1484_v17, %v1480_v39  ;;  %847 = vadd.xlane.f32.xlu0 %v319_v13  ;;  %v992_v20 = vpop.xlane.xlu1 %991  ;;  %v1105_v17 = vld [vmem:[%s2934_s1 + $0xe0] sm:$0xff] }
  0xe8   :  { %v958_v21 = vpop.xlane.xlu0 %957  ;;  %v1736_v25 = vrot.slane %v992_v20, %v2350_v63 }
  0xe9   :  { %v1652_v26 = vrot.slane %v958_v21, %v2329_v22 }
  0xea   :  { %v1737_v28 = vsel %vm1321_vm4, %v1736_v25, %v1732_v55  ;;  %941 = vadd.xlane.f32.xlu1 %v366_v23  ;;  %v431_v23 = vld [vmem:[#allocation3 + $0x3e8] sm:$0xff] }
  0xeb   :  { %v1653_v29 = vsel %vm1314_vm3, %v1652_v26, %v1648_v46  ;;  %907 = vadd.xlane.f32.xlu0 %v349_v24  ;;  %v1052_v30 = vpop.xlane.xlu1 %1051  ;;  %v414_v24 = vld [vmem:[#allocation3 + $0x360] sm:$0xff] }
  0xec   :  { %v1018_v31 = vpop.xlane.xlu0 %1017  ;;  %v1884_v35 = vrot.slane %v1052_v30, %v2310_v49 }
  0xed   :  { %v1800_v36 = vrot.slane %v1018_v31, %v2300_v33  ;;  %v1103_v31 = vld [vmem:[%s2934_s1 + $0xd0] sm:$0xff] }
  0xee   :  { %v1885_v38 = vsel %vm1307_vm2, %v1884_v35, %v1880_v0  ;;  %1009 = vadd.xlane.f32.xlu1 %v400_v32  ;;  %v1330_v0 = vadd.s32 4294967240, %v2278_v5  ;;  %v351_v35 = vld [vmem:[#allocation3 + $0x168] sm:$0xff] }
  0xef   :  { %v1801_v39 = vsel %vm1300_vm1, %v1800_v36, %v1796_v1  ;;  %975 = vadd.xlane.f32.xlu0 %v383_v34  ;;  %v866_v40 = vpop.xlane.xlu1 %865  ;;  %v1092_v1 = vld [vmem:[%s2934_s1 + $0x78] sm:$0xff]  ;;  %vm1147_vm1 = vcmp.eq.s32.totalorder %v2278_v5, 1 }
  0xf0   :  { %v832_v41 = vpop.xlane.xlu0 %831  ;;  %v1425_v44 = vrot.slane %v866_v40, %v2370_v37  ;;  %2115 = vmatpush3.msra.mxu0 %v1092_v1  ;;  %v2413_v13 = vsub.s32 %v1330_v0, %v2280_v8  ;;  %v321_v36 = vld [vmem:[#allocation3 + $0x78] sm:$0xff]  ;;  %v1087_v40 = vld [vmem:[%s2934_s1 + $0x50] sm:$0xff]  ;;  %v415_v1 = vld [vmem:[#allocation3 + $0x368] sm:$0xff] }
  0xf1   :  { %v1320_v45 = vrot.slane %v832_v41, %v2350_v63  ;;  %2116 = vmatprep.subr.mxu0 %v1107_v2  ;;  %v1102_v41 = vld [vmem:[%s2934_s1 + $0xc8] sm:$0xff]  ;;  %v432_v0 = vld [vmem:[#allocation3 + $0x3f0] sm:$0xff] }
  0xf2   :  { %v1426_v33 = vsel %vm1328_vm5, %v1425_v44, %v1421_v15  ;;  %1069 = vadd.xlane.f32.xlu1 %v430_v42  ;;  %v401_v15 = vld [vmem:[#allocation3 + $0x2f8] sm:$0xff]  ;;  %2117 = vmatpush3.msra.mxu0 %v1091_v6  ;;  %v1086_v44 = vld [vmem:[%s2934_s1 + $0x48] sm:$0xff] }
  0xf3   :  { %v1322_v46 = vsel %vm1321_vm4, %v1320_v45, %v1315_v9  ;;  %1035 = vadd.xlane.f32.xlu0 %v413_v43  ;;  %v926_v47 = vpop.xlane.xlu1 %925  ;;  %v384_v9 = vld [vmem:[#allocation3 + $0x270] sm:$0xff]  ;;  %2118 = vmatprep.subr.mxu0 %v1106_v10  ;;  %v1138_v2 = vld [vmem:[%s2934_s1 + $0x1e8] sm:$0xff] }
  0xf4   :  { %v892_v48 = vpop.xlane.xlu0 %891  ;;  %v1573_v52 = vrot.slane %v926_v47, %v2329_v22  ;;  %2119 = vmatpush3.msra.mxu0 %v1090_v16  ;;  %v368_v47 = vld [vmem:[#allocation3 + $0x1f0] sm:$0xff] }
  0xf5   :  { %v1489_v53 = vrot.slane %v892_v48, %v2310_v49  ;;  %2120 = vmatprep.subr.mxu0 %v1105_v17  ;;  %v1140_v48 = vld [vmem:[%s2934_s1 + $0x1f8] sm:$0xff] }
  0xf6   :  { %v2381_v54 = vsel %vm1314_vm3, %v1573_v52, %v1569_v18  ;;  %883 = vadd.xlane.f32.xlu1 %v337_v50  ;;  %v1337_v52 = vadd.s32 4294967232, %v2278_v5  ;;  %2149 = vmatprep.subr.mxu1 %v1140_v48 }
  0xf7   :  { %v2384_v55 = vsel %vm1307_vm2, %v1489_v53, %v1485_v19  ;;  %849 = vadd.xlane.f32.xlu0 %v320_v51  ;;  %v994_v56 = vpop.xlane.xlu1 %993  ;;  %v1101_v53 = vld [vmem:[%s2934_s1 + $0xc0] sm:$0xff] }
  0xf8   :  { %v960_v57 = vpop.xlane.xlu0 %959  ;;  %v1741_v61 = vrot.slane %v994_v56, %v2370_v37  ;;  %v1139_v56 = vld [vmem:[%s2934_s1 + $0x1f0] sm:$0xff]  ;;  %v2504_v6 = vsub.s32 %v1337_v52, %v2280_v8  ;;  %v1344_v52 = vadd.s32 4294967224, %v2278_v5 }
  0xf9   :  { %v1657_v62 = vrot.slane %v960_v57, %v2350_v63 }
  0xfa   :  { %v2399_v3 = vsel %vm1328_vm5, %v1741_v61, %v1737_v28  ;;  %943 = vadd.xlane.f32.xlu1 %v367_v58  ;;  %v1088_v28 = vld [vmem:[%s2934_s1 + $0x58] sm:$0xff] }
  0xfb   :  { %v2402_v4 = vsel %vm1321_vm4, %v1657_v62, %v1653_v29  ;;  %909 = vadd.xlane.f32.xlu0 %v350_v59  ;;  %v1054_v14 = vpop.xlane.xlu1 %1053  ;;  %v1100_v59 = vld [vmem:[%s2934_s1 + $0xb8] sm:$0xff] }
  0xfc   :  { %v1020_v7 = vpop.xlane.xlu0 %1019  ;;  %v1889_v11 = vrot.slane %v1054_v14, %v2329_v22  ;;  %v1084_v14 = vld [vmem:[%s2934_s1 + $0x38] sm:$0xff] }
  0xfd   :  { %v1805_v12 = vrot.slane %v1020_v7, %v2310_v49  ;;  %v1089_v49 = vld [vmem:[%s2934_s1 + $0x60] sm:$0xff]  ;;  %v1122_v7 = vld [vmem:[%s2934_s1 + $0x168] sm:$0xff] }
  0xfe   :  { %v2422_v18 = vsel %vm1314_vm3, %v1889_v11, %v1885_v38  ;;  %1011 = vadd.xlane.f32.xlu1 %v401_v15  ;;  %2121 = vmatpush3.msra.mxu0 %v1089_v49  ;;  %v1099_v15 = vld [vmem:[%s2934_s1 + $0xb0] sm:$0xff]  ;;  %v369_v49 = vld [vmem:[#allocation3 + $0x1f8] sm:$0xff] }
  0xff   :  { %v2425_v19 = vsel %vm1307_vm2, %v1805_v12, %v1801_v39  ;;  %977 = vadd.xlane.f32.xlu0 %v384_v9  ;;  %v868_v20 = vpop.xlane.xlu1 %867  ;;  %2122 = vmatprep.subr.mxu0 %v1104_v27  ;;  %v1083_v11 = vld [vmem:[%s2934_s1 + $0x30] sm:$0xff]  ;;  %v1121_v12 = vld [vmem:[%s2934_s1 + $0x160] sm:$0xff]  ;;  %vm2095_vm2 = vcmask 9216  }
 0x100   :  { %v834_v21 = vpop.xlane.xlu0 %833  ;;  %v1430_v25 = vrot.slane %v868_v20, %v2413_v13  ;;  %2123 = vmatpush3.msra.mxu0 %v1088_v28  ;;  %v1097_v28 = vld [vmem:[%s2934_s1 + $0xa0] sm:$0xff] }
 0x101   :  { %v1327_v26 = vrot.slane %v834_v21, %v2370_v37  ;;  %2124 = vmatprep.subr.mxu0 %v1103_v31  ;;  %v1098_v21 = vld [vmem:[%s2934_s1 + $0xa8] sm:$0xff]  ;;  %v1135_v31 = vld [vmem:[%s2934_s1 + $0x1d0] sm:$0xff] }
 0x102   :  { %v2439_v29 = vsel %vm1335_vm6, %v1430_v25, %v1426_v33  ;;  %1071 = vadd.xlane.f32.xlu1 %v431_v23  ;;  %2125 = vmatpush3.msra.mxu0 %v1087_v40  ;;  %v1136_v23 = vld [vmem:[%s2934_s1 + $0x1d8] sm:$0xff] }
 0x103   :  { %v2442_v30 = vsel %vm1328_vm5, %v1327_v26, %v1322_v46  ;;  %1037 = vadd.xlane.f32.xlu0 %v414_v24  ;;  %v928_v32 = vpop.xlane.xlu1 %927  ;;  %v385_v46 = vld [vmem:[#allocation3 + $0x278] sm:$0xff]  ;;  %2126 = vmatprep.subr.mxu0 %v1102_v41  ;;  %v1082_v24 = vld [vmem:[%s2934_s1 + $0x28] sm:$0xff] }
 0x104   :  { %v894_v34 = vpop.xlane.xlu0 %893  ;;  %v1578_v38 = vrot.slane %v928_v32, %v2350_v63  ;;  %2127 = vmatpush3.msra.mxu0 %v1086_v44  ;;  %v1120_v25 = vld [vmem:[%s2934_s1 + $0x158] sm:$0xff]  ;;  %v1134_v41 = vld [vmem:[%s2934_s1 + $0x1c8] sm:$0xff] }
 0x105   :  { %v1494_v39 = vrot.slane %v894_v34, %v2329_v22  ;;  %2128 = vmatprep.subr.mxu0 %v1101_v53  ;;  %v1096_v40 = vld [vmem:[%s2934_s1 + $0x98] sm:$0xff]  ;;  %v1095_v53 = vld [vmem:[%s2934_s1 + $0x90] sm:$0xff] }
 0x106   :  { %v2457_v42 = vsel %vm1321_vm4, %v1578_v38, %v2381_v54  ;;  %911 = vadd.xlane.f32.xlu1 %v351_v35  ;;  %v1124_v54 = vld [vmem:[%s2934_s1 + $0x178] sm:$0xff]  ;;  %v1081_v38 = vld [vmem:[%s2934_s1 + $0x20] sm:$0xff] }
 0x107   :  { %v2461_v43 = vsel %vm1314_vm3, %v1494_v39, %v2384_v55  ;;  %851 = vadd.xlane.f32.xlu0 %v321_v36  ;;  %v996_v45 = vpop.xlane.xlu1 %995  ;;  %v1085_v55 = vld [vmem:[%s2934_s1 + $0x40] sm:$0xff]  ;;  %2150 = vmatpush3.msra.mxu1 %v1124_v54  ;;  %v433_v35 = vld [vmem:[#allocation3 + $0x3f8] sm:$0xff]  ;;  %v416_v36 = vld [vmem:[#allocation3 + $0x370] sm:$0xff] }
 0x108   :  { %v962_v33 = vpop.xlane.xlu0 %961  ;;  %v1746_v50 = vrot.slane %v996_v45, %v2413_v13  ;;  %2151 = vmatprep.subr.mxu1 %v1139_v56  ;;  %2129 = vmatpush3.msra.mxu0 %v1085_v55  ;;  %v1119_v39 = vld [vmem:[%s2934_s1 + $0x150] sm:$0xff]  ;;  %v1133_v54 = vld [vmem:[%s2934_s1 + $0x1c0] sm:$0xff] }
 0x109   :  { %v1662_v51 = vrot.slane %v962_v33, %v2370_v37  ;;  %2152 = vmatpush3.msra.mxu1 %v1123_v60  ;;  %2130 = vmatprep.subr.mxu0 %v1100_v59  ;;  %v1080_v33 = vld [vmem:[%s2934_s1 + $0x18] sm:$0xff]  ;;  %v1079_v55 = vld [vmem:[%s2934_s1 + $0x10] sm:$0xff]  ;;  %v1117_v56 = vld [vmem:[%s2934_s1 + $0x140] sm:$0xff] }
 0x10a   :  { %v2486_v57 = vsel %vm1335_vm6, %v1746_v50, %v2399_v3  ;;  %979 = vadd.xlane.f32.xlu1 %v385_v46  ;;  %2153 = vmatprep.subr.mxu1 %v1138_v2  ;;  %v1118_v46 = vld [vmem:[%s2934_s1 + $0x148] sm:$0xff]  ;;  %v417_v50 = vld [vmem:[#allocation3 + $0x378] sm:$0xff] }
 0x10b   :  { %v2490_v58 = vsel %vm1328_vm5, %v1662_v51, %v2402_v4  ;;  %945 = vadd.xlane.f32.xlu0 %v368_v47  ;;  %v1056_v61 = vpop.xlane.xlu1 %1055  ;;  %2131 = vmatpush3.msra.mxu0 %v1084_v14  ;;  %v353_v51 = vld [vmem:[#allocation3 + $0x178] sm:$0xff]  ;;  %v1093_v14 = vld [vmem:[%s2934_s1 + $0x80] sm:$0xff] }
 0x10c   :  { %v1022_v62 = vpop.xlane.xlu0 %1021  ;;  %v1894_v3 = vrot.slane %v1056_v61, %v2350_v63  ;;  %2154 = vmatpush3.msra.mxu1 %v1122_v7  ;;  %2132 = vmatprep.subr.mxu0 %v1099_v15  ;;  %v1094_v61 = vld [vmem:[%s2934_s1 + $0x88] sm:$0xff]  ;;  %v1131_v7 = vld [vmem:[%s2934_s1 + $0x1b0] sm:$0xff]  ;;  %v1077_v15 = vld [vmem:[%s2934_s1] sm:$0xff] }
 0x10d   :  { %v1810_v4 = vrot.slane %v1022_v62, %v2329_v22  ;;  %v1137_v22 = vld [vmem:[%s2934_s1 + $0x1e0] sm:$0xff]  ;;  %2133 = vmatpush3.msra.mxu0 %v1083_v11  ;;  %v1132_v62 = vld [vmem:[%s2934_s1 + $0x1b8] sm:$0xff] }
 0x10e   :  { %v2520_v9 = vsel %vm1321_vm4, %v1894_v3, %v2422_v18  ;;  %1073 = vadd.xlane.f32.xlu1 %v432_v0  ;;  %v352_v18 = vld [vmem:[#allocation3 + $0x170] sm:$0xff]  ;;  %2155 = vmatprep.subr.mxu1 %v1137_v22 }
 0x10f   :  { %v2524_v10 = vsel %vm1314_vm3, %v1810_v4, %v2425_v19  ;;  %1039 = vadd.xlane.f32.xlu0 %v415_v1  ;;  %v870_v16 = vpop.xlane.xlu1 %869  ;;  %2156 = vmatpush3.msra.mxu1 %v1121_v12  ;;  %v2626_v4 = vsub.s32 %v1344_v52, %v2280_v8  ;;  %v1130_v12 = vld [vmem:[%s2934_s1 + $0x1a8] sm:$0xff] }
 0x110   :  { %v836_v17 = vpop.xlane.xlu0 %835  ;;  %v1435_v19 = vrot.slane %v870_v16, %v2504_v6  ;;  %2134 = vmatprep.subr.mxu0 %v1098_v21  ;;  %2157 = vmatprep.subr.mxu1 %v1136_v23  ;;  %v1128_v23 = vld [vmem:[%s2934_s1 + $0x198] sm:$0xff] }
 0x111   :  { %v1334_v20 = vrot.slane %v836_v17, %v2413_v13  ;;  %2135 = vmatpush3.msra.mxu0 %v1082_v24  ;;  %2158 = vmatpush3.msra.mxu1 %v1120_v25 }
 0x112   :  { %v2548_v26 = vsel %vm1342_vm7, %v1435_v19, %v2439_v29  ;;  %947 = vadd.xlane.f32.xlu1 %v369_v49  ;;  %2136 = vmatprep.subr.mxu0 %v1097_v28  ;;  %v1114_v49 = vld [vmem:[%s2934_s1 + $0x128] sm:$0xff]  ;;  %v1113_v19 = vld [vmem:[%s2934_s1 + $0x120] sm:$0xff]  ;;  %v1112_v28 = vld [vmem:[%s2934_s1 + $0x118] sm:$0xff] }
 0x113   :  { %v2552_v27 = vsel %vm1335_vm6, %v1334_v20, %v2442_v30  ;;  %913 = vadd.xlane.f32.xlu0 %v352_v18  ;;  %v930_v32 = vpop.xlane.xlu1 %929  ;;  %2159 = vmatprep.subr.mxu1 %v1135_v31 }
 0x114   :  { %v896_v34 = vpop.xlane.xlu0 %895  ;;  %v1583_v29 = vrot.slane %v930_v32, %v2370_v37  ;;  %2137 = vmatpush3.msra.mxu0 %v1081_v38  ;;  %2160 = vmatpush3.msra.mxu1 %v1119_v39  ;;  %v1110_v38 = vld [vmem:[%s2934_s1 + $0x108] sm:$0xff] }
 0x115   :  { %v1499_v30 = vrot.slane %v896_v34, %v2350_v63  ;;  %2138 = vmatprep.subr.mxu0 %v1096_v40  ;;  %2161 = vmatprep.subr.mxu1 %v1134_v41  ;;  %v1351_v41 = vadd.s32 4294967216, %v2278_v5 }
 0x116   :  { %v2576_v44 = vsel %vm1328_vm5, %v1583_v29, %v2457_v42  ;;  %1075 = vadd.xlane.f32.xlu1 %v433_v35  ;;  %2139 = vmatpush3.msra.mxu0 %v1080_v33 }
 0x117   :  { %v2580_v45 = vsel %vm1321_vm4, %v1499_v30, %v2461_v43  ;;  %1041 = vadd.xlane.f32.xlu0 %v416_v36  ;;  %v998_v47 = vpop.xlane.xlu1 %997  ;;  %2162 = vmatpush3.msra.mxu1 %v1118_v46  ;;  %v1126_v36 = vld [vmem:[%s2934_s1 + $0x188] sm:$0xff] }
 0x118   :  { %v964_v48 = vpop.xlane.xlu0 %963  ;;  %v1751_v42 = vrot.slane %v998_v47, %v2504_v6  ;;  %2140 = vmatprep.subr.mxu0 %v1095_v53  ;;  %2163 = vmatprep.subr.mxu1 %v1133_v54 }
 0x119   :  { %v1667_v43 = vrot.slane %v964_v48, %v2413_v13  ;;  %2141 = vmatpush3.msra.mxu0 %v1079_v55  ;;  %2164 = vmatpush3.msra.mxu1 %v1117_v56 }
 0x11a   :  { %v2605_v59 = vsel %vm1342_vm7, %v1751_v42, %v2486_v57  ;;  %1043 = vadd.xlane.f32.xlu1 %v417_v50  ;;  %v1078_v57 = vld [vmem:[%s2934_s1 + $0x8] sm:$0xff]  ;;  %2142 = vmatprep.subr.mxu0 %v1094_v61  ;;  %v2702_v42 = vsub.s32 %v1351_v41, %v2280_v8 }
 0x11b   :  { %v2609_v60 = vsel %vm1335_vm6, %v1667_v43, %v2490_v58  ;;  %915 = vadd.xlane.f32.xlu0 %v353_v51  ;;  %v1058_v0 = vpop.xlane.xlu1 %1057  ;;  %v1116_v58 = vld [vmem:[%s2934_s1 + $0x138] sm:$0xff]  ;;  %2165 = vmatprep.subr.mxu1 %v1132_v62 }
 0x11c   :  { %v1024_v1 = vpop.xlane.xlu0 %1023  ;;  %v1899_v2 = vrot.slane %v1058_v0, %v2370_v37  ;;  %2143 = vmatpush3.msra.mxu0 %v1078_v57  ;;  %2166 = vmatpush3.msra.mxu1 %v1116_v58 }
 0x11d   :  { %v1815_v3 = vrot.slane %v1024_v1, %v2350_v63  ;;  %v1115_v63 = vld [vmem:[%s2934_s1 + $0x130] sm:$0xff]  ;;  %2144 = vmatprep.subr.mxu0 %v1093_v14  ;;  %2167 = vmatprep.subr.mxu1 %v1131_v7  ;;  %v1358_v7 = vadd.s32 4294967208, %v2278_v5 }
 0x11e   :  { %v1900_v22 = vsel %vm1328_vm5, %v1899_v2, %v2520_v9  ;;  %2145 = vmatpush3.msra.mxu0 %v1077_v15  ;;  %2168 = vmatpush3.msra.mxu1 %v1115_v63 }
 0x11f   :  { %v1816_v11 = vsel %vm1321_vm4, %v1815_v3, %v2524_v10  ;;  %v872_v16 = vpop.xlane.xlu1 %871  ;;  %v1129_v10 = vld [vmem:[%s2934_s1 + $0x1a0] sm:$0xff]  ;;  %2169 = vmatprep.subr.mxu1 %v1130_v12 }
 0x120   :  { %v838_v17 = vpop.xlane.xlu0 %837  ;;  %v1440_v9 = vrot.slane %v872_v16, %v2626_v4  ;;  %2170 = vmatpush3.msra.mxu1 %v1114_v49 }
 0x121   :  { %v1341_v18 = vrot.slane %v838_v17, %v2504_v6  ;;  %2171 = vmatprep.subr.mxu1 %v1129_v10  ;;  %v2724_v17 = vsub.s32 %v1358_v7, %v2280_v8 }
 0x122   :  { %v1441_v20 = vsel %vm1349_vm8, %v1440_v9, %v2548_v26  ;;  %2172 = vmatpush3.msra.mxu1 %v1113_v19  ;;  %v1127_v26 = vld [vmem:[%s2934_s1 + $0x190] sm:$0xff] }
 0x123   :  { %v1343_v21 = vsel %vm1342_vm7, %v1341_v18, %v2552_v27  ;;  %v932_v24 = vpop.xlane.xlu1 %931  ;;  %2173 = vmatprep.subr.mxu1 %v1128_v23  ;;  %v1111_v27 = vld [vmem:[%s2934_s1 + $0x110] sm:$0xff] }
 0x124   :  { %v898_v25 = vpop.xlane.xlu0 %897  ;;  %v1588_v31 = vrot.slane %v932_v24, %v2413_v13  ;;  %2174 = vmatpush3.msra.mxu1 %v1112_v28 }
 0x125   :  { %v1504_v32 = vrot.slane %v898_v25, %v2370_v37  ;;  %2175 = vmatprep.subr.mxu1 %v1127_v26 }
 0x126   :  { %v1589_v34 = vsel %vm1335_vm6, %v1588_v31, %v2576_v44  ;;  %2176 = vmatpush3.msra.mxu1 %v1111_v27  ;;  %v1125_v44 = vld [vmem:[%s2934_s1 + $0x180] sm:$0xff] }
 0x127   :  { %v1505_v35 = vsel %vm1328_vm5, %v1504_v32, %v2580_v45  ;;  %v1000_v29 = vpop.xlane.xlu1 %999  ;;  %2177 = vmatprep.subr.mxu1 %v1126_v36  ;;  %v1109_v45 = vld [vmem:[%s2934_s1 + $0x100] sm:$0xff]  ;;  %s1144_s1 = sld [smem:[#allocation7]] }
 0x128   :  { %v966_v30 = vpop.xlane.xlu0 %965  ;;  %v1756_v39 = vrot.slane %v1000_v29, %v2626_v4  ;;  %2178 = vmatpush3.msra.mxu1 %v1110_v38 }
 0x129   :  { %v1672_v40 = vrot.slane %v966_v30, %v2504_v6  ;;  %2179 = vmatprep.subr.mxu1 %v1125_v44 }
 0x12a   :  { %v1757_v33 = vsel %vm1349_vm8, %v1756_v39, %v2605_v59  ;;  %2180 = vmatpush3.msra.mxu1 %v1109_v45 }
 0x12b   :  { %v1673_v46 = vsel %vm1342_vm7, %v1672_v40, %v2609_v60  ;;  %v1060_v47 = vpop.xlane.xlu1 %1059 }
 0x12c   :  { %v1026_v48 = vpop.xlane.xlu0 %1025  ;;  %v1904_v50 = vrot.slane %v1060_v47, %v2413_v13 }
 0x12d   :  { %v1820_v51 = vrot.slane %v1026_v48, %v2370_v37 }
 0x12e   :  { %v1905_v43 = vsel %vm1335_vm6, %v1904_v50, %v1900_v22 }
 0x12f   :  { %v1821_v52 = vsel %vm1328_vm5, %v1820_v51, %v1816_v11  ;;  %v874_v53 = vpop.xlane.xlu1 %873 }
 0x130   :  { %v840_v54 = vpop.xlane.xlu0 %839  ;;  %v1445_v55 = vrot.slane %v874_v53, %v2702_v42 }
 0x131   :  { %v1348_v56 = vrot.slane %v840_v54, %v2626_v4 }
 0x132   :  { %v1446_v59 = vsel %vm1356_vm9, %v1445_v55, %v1441_v20 }
 0x133   :  { %v1350_v60 = vsel %vm1349_vm8, %v1348_v56, %v1343_v21  ;;  %v934_v37 = vpop.xlane.xlu1 %933 }
 0x134   :  { %v900_v61 = vpop.xlane.xlu0 %899  ;;  %v1593_v62 = vrot.slane %v934_v37, %v2504_v6 }
 0x135   :  { %v1509_v0 = vrot.slane %v900_v61, %v2413_v13 }
 0x136   :  { %v1594_v1 = vsel %vm1342_vm7, %v1593_v62, %v1589_v34 }
 0x137   :  { %v1510_v57 = vsel %vm1335_vm6, %v1509_v0, %v1505_v35  ;;  %v1002_v58 = vpop.xlane.xlu1 %1001 }
 0x138   :  { %v968_v2 = vpop.xlane.xlu0 %967  ;;  %v1761_v3 = vrot.slane %v1002_v58, %v2702_v42 }
 0x139   :  { %v1677_v14 = vrot.slane %v968_v2, %v2626_v4 }
 0x13a   :  { %v2718_v15 = vsel %vm1356_vm9, %v1761_v3, %v1757_v33 }
 0x13b   :  { %v1678_v63 = vsel %vm1349_vm8, %v1677_v14, %v1673_v46  ;;  %v1062_v22 = vpop.xlane.xlu1 %1061 }
 0x13c   :  { %v1028_v11 = vpop.xlane.xlu0 %1027  ;;  %v1909_v12 = vrot.slane %v1062_v22, %v2504_v6 }
 0x13d   :  { %v1825_v16 = vrot.slane %v1028_v11, %v2413_v13 }
 0x13e   :  { %v1910_v49 = vsel %vm1342_vm7, %v1909_v12, %v1905_v43  ;;  %v1372_v12 = vadd.s32 4294967192, %v2278_v5 }
 0x13f   :  { %v1826_v9 = vsel %vm1335_vm6, %v1825_v16, %v1821_v52  ;;  %v876_v18 = vpop.xlane.xlu1 %875  ;;  %v1379_v16 = vadd.s32 4294967184, %v2278_v5 }
 0x140   :  { %v842_v10 = vpop.xlane.xlu0 %841  ;;  %v1450_v19 = vrot.slane %v876_v18, %v2724_v17 }
 0x141   :  { %v1355_v20 = vrot.slane %v842_v10, %v2702_v42 }
 0x142   :  { %v2731_v21 = vsel %vm1363_vm10, %v1450_v19, %v1446_v59  ;;  %v2800_v19 = vsub.s32 %v1372_v12, %v2280_v8 }
 0x143   :  { %v1357_v23 = vsel %vm1356_vm9, %v1355_v20, %v1350_v60  ;;  %v936_v13 = vpop.xlane.xlu1 %935  ;;  %v2803_v20 = vsub.s32 %v1379_v16, %v2280_v8 }
 0x144   :  { %v902_v24 = vpop.xlane.xlu0 %901  ;;  %v1598_v25 = vrot.slane %v936_v13, %v2626_v4 }
 0x145   :  { %v1514_v28 = vrot.slane %v902_v24, %v2504_v6 }
 0x146   :  { %v1599_v31 = vsel %vm1349_vm8, %v1598_v25, %v1594_v1 }
 0x147   :  { %v1515_v32 = vsel %vm1342_vm7, %v1514_v28, %v1510_v57  ;;  %v2738_v26 = vpop.xlane.xlu1 %1003 }
 0x148   :  { %v970_v27 = vpop.xlane.xlu0 %969 }
 0x149   :  { %v1682_v34 = vrot.slane %v970_v27, %v2702_v42 }
 0x14b   :  { %v2742_v35 = vsel %vm1356_vm9, %v1682_v34, %v1678_v63  ;;  %v1064_v36 = vpop.xlane.xlu1 %1063  ;;  %v1365_v63 = vadd.s32 4294967200, %v2278_v5 }
 0x14c   :  { %v1030_v29 = vpop.xlane.xlu0 %1029  ;;  %v1914_v30 = vrot.slane %v1064_v36, %v2626_v4 }
 0x14d   :  { %v1830_v38 = vrot.slane %v1030_v29, %v2504_v6 }
 0x14e   :  { %v2747_v39 = vsel %vm1349_vm8, %v1914_v30, %v1910_v49  ;;  %v1386_v49 = vadd.s32 4294967176, %v2278_v5 }
 0x14f   :  { %v1831_v40 = vsel %vm1342_vm7, %v1830_v38, %v1826_v9  ;;  %v878_v41 = vpop.xlane.xlu1 %877  ;;  %v2797_v9 = vsub.s32 %v1365_v63, %v2280_v8 }
 0x150   :  { %v844_v44 = vpop.xlane.xlu0 %843  ;;  %v2808_v13 = vsub.s32 %v1386_v49, %v2280_v8 }
 0x151   :  { %v1362_v45 = vrot.slane %v844_v44, %v2724_v17  ;;  %v1455_v24 = vrot.slane %v878_v41, %v2797_v9 }
 0x153   :  { %v2752_v33 = vsel %vm1363_vm10, %v1362_v45, %v1357_v23  ;;  %v938_v46 = vpop.xlane.xlu1 %937  ;;  %v1766_v23 = vrot.slane %v2738_v26, %v2724_v17  ;;  %v1456_v29 = vsel %vm1370_vm11, %v1455_v24, %v2731_v21 }
 0x154   :  { %v904_v47 = vpop.xlane.xlu0 %903  ;;  %v1603_v48 = vrot.slane %v938_v46, %v2702_v42 }
 0x155   :  { %v1519_v50 = vrot.slane %v904_v47, %v2626_v4  ;;  %v1767_v8 = vsel %vm1363_vm10, %v1766_v23, %v2718_v15 }
 0x156   :  { %v2757_v6 = vsel %vm1356_vm9, %v1603_v48, %v1599_v31 }
 0x157   :  { %v2760_v51 = vsel %vm1349_vm8, %v1519_v50, %v1515_v32  ;;  %v1006_v43 = vpop.xlane.xlu1 %1005 }
 0x158   :  { %v2762_v52 = vpop.xlane.xlu0 %971  ;;  %v1771_v25 = vrot.slane %v1006_v43, %v2797_v9 }
 0x15a   :  { %v1772_v30 = vsel %vm1370_vm11, %v1771_v25, %v1767_v8 }
 0x15b   :  { %v2764_v53 = vpop.xlane.xlu1 %1065 }
 0x15c   :  { %v1032_v54 = vpop.xlane.xlu0 %1031 }
 0x15d   :  { %v1835_v55 = vrot.slane %v1032_v54, %v2626_v4  ;;  %v1687_v54 = vrot.slane %v2762_v52, %v2724_v17 }
 0x15f   :  { %v2768_v56 = vsel %vm1349_vm8, %v1835_v55, %v1831_v40  ;;  %v880_v59 = vpop.xlane.xlu1 %879  ;;  %v1688_v52 = vsel %vm1363_vm10, %v1687_v54, %v2742_v35 }
 0x160   :  { %v2770_v60 = vpop.xlane.xlu0 %845  ;;  %v1460_v32 = vrot.slane %v880_v59, %v2800_v19 }
 0x161   :  { %v1369_v55 = vrot.slane %v2770_v60, %v2797_v9 }
 0x162   :  { %v1461_v41 = vsel %vm1377_vm12, %v1460_v32, %v1456_v29 }
 0x163   :  { %v2772_v37 = vpop.xlane.xlu1 %939 }
 0x164   :  { %v2774_v61 = vpop.xlane.xlu0 %905  ;;  %v1608_v8 = vrot.slane %v2772_v37, %v2724_v17 }
 0x167   :  { %v1008_v62 = vpop.xlane.xlu1 %1007 }
 0x168   :  { %v2776_v0 = vpop.xlane.xlu0 %973  ;;  %v1776_v27 = vrot.slane %v1008_v62, %v2800_v19 }
 0x169   :  { %v1692_v59 = vrot.slane %v2776_v0, %v2797_v9  ;;  %v1371_v0 = vsel %vm1370_vm11, %v1369_v55, %v2752_v33 }
 0x16a   :  { %v1777_v44 = vsel %vm1377_vm12, %v1776_v27, %v1772_v30 }
 0x16b   :  { %v2778_v1 = vpop.xlane.xlu1 %1067  ;;  %v1693_v49 = vsel %vm1370_vm11, %v1692_v59, %v1688_v52 }
 0x16c   :  { %v2780_v57 = vpop.xlane.xlu0 %1033  ;;  %v1924_v29 = vrot.slane %v2778_v1, %v2724_v17  ;;  %v1609_v1 = vsel %vm1363_vm10, %v1608_v8, %v2757_v6 }
 0x16d   :  { %v1840_v30 = vrot.slane %v2780_v57, %v2702_v42 }
 0x16f   :  { %v882_v58 = vpop.xlane.xlu1 %881 }
 0x170   :  { %v2782_v2 = vpop.xlane.xlu0 %847  ;;  %v1465_v34 = vrot.slane %v882_v58, %v2803_v20 }
 0x172   :  { %v1466_v15 = vsel %vm1384_vm13, %v1465_v34, %v1461_v41 }
 0x173   :  { %v2784_v4 = vpop.xlane.xlu1 %941 }
 0x174   :  { %v2786_v3 = vpop.xlane.xlu0 %907 }
 0x177   :  { %v1010_v14 = vpop.xlane.xlu1 %1009 }
 0x178   :  { %v976_v7 = vpop.xlane.xlu0 %975  ;;  %v1781_v26 = vrot.slane %v1010_v14, %v2803_v20  ;;  %v1376_v14 = vrot.slane %v2782_v2, %v2800_v19 }
 0x179   :  { %v1697_v63 = vrot.slane %v976_v7, %v2800_v19 }
 0x17a   :  { %v1782_v46 = vsel %vm1384_vm13, %v1781_v26, %v1777_v44  ;;  %v1378_v2 = vsel %vm1377_vm12, %v1376_v14, %v1371_v0  ;;  %v1919_v26 = vrot.slane %v2764_v53, %v2702_v42 }
 0x17b   :  { %v2789_v22 = vpop.xlane.xlu1 %1069  ;;  %v1698_v7 = vsel %vm1377_vm12, %v1697_v63, %v1693_v49 }
 0x17c   :  { %v2791_v11 = vpop.xlane.xlu0 %1035 }
 0x17d   :  { %v1845_v6 = vrot.slane %v2791_v11, %v2724_v17 }
 0x17f   :  { %v884_v18 = vpop.xlane.xlu1 %883 }
 0x180   :  { %v850_v10 = vpop.xlane.xlu0 %849  ;;  %v1470_v36 = vrot.slane %v884_v18, %v2808_v13 }
 0x181   :  { %v1383_v12 = vrot.slane %v850_v10, %v2803_v20 }
 0x182   :  { %v1471_v47 = vsel %vm1391_vm14, %v1470_v36, %v1466_v15  ;;  %v1524_v36 = vrot.slane %v2774_v61, %v2702_v42  ;;  %v1920_v61 = vsel %vm1356_vm9, %v1919_v26, %v2747_v39  ;;  %v1529_v39 = vrot.slane %v2786_v3, %v2724_v17 }
 0x183   :  { %v2812_v28 = vpop.xlane.xlu1 %943  ;;  %v1385_v24 = vsel %vm1384_vm13, %v1383_v12, %v1378_v2 }
 0x184   :  { %v2814_v31 = vpop.xlane.xlu0 %909  ;;  %v1618_v53 = vrot.slane %v2812_v28, %v2800_v19  ;;  %v1525_v42 = vsel %vm1356_vm9, %v1524_v36, %v2760_v51 }
 0x187   :  { %v1012_v38 = vpop.xlane.xlu1 %1011 }
 0x188   :  { %v978_v40 = vpop.xlane.xlu0 %977  ;;  %v1786_v45 = vrot.slane %v1012_v38, %v2808_v13  ;;  %v1613_v38 = vrot.slane %v2784_v4, %v2797_v9  ;;  %v1925_v4 = vsel %vm1363_vm10, %v1924_v29, %v1920_v61 }
 0x189   :  { %v1702_v16 = vrot.slane %v978_v40, %v2803_v20  ;;  %v1929_v40 = vrot.slane %v2789_v22, %v2797_v9  ;;  %v1841_v22 = vsel %vm1356_vm9, %v1840_v30, %v2768_v56  ;;  %v1534_v56 = vrot.slane %v2814_v31, %v2797_v9 }
 0x18a   :  { %v1787_v21 = vsel %vm1391_vm14, %v1786_v45, %v1782_v46  ;;  %v1614_v45 = vsel %vm1370_vm11, %v1613_v38, %v1609_v1 }
 0x18b   :  { %v1072_v48 = vpop.xlane.xlu1 %1071  ;;  %v1948_v43 = vsel %vm1946_vm15, %v1787_v21, %v1471_v47  ;;  %v1703_v25 = vsel %vm1384_vm13, %v1702_v16, %v1698_v7  ;;  %v1930_v15 = vsel %vm1370_vm11, %v1929_v40, %v1925_v4  ;;  %v1619_v46 = vsel %vm1377_vm12, %v1618_v53, %v1614_v45 }
 0x18c   :  { %v2833_v50 = vpop.xlane.xlu0 %1037  ;;  %2019 = vmatprep.mubr.f32.mxu0 %v1948_v43  ;;  %v1934_v57 = vrot.slane %v1072_v48, %v2800_v19 }
 0x18d   :  { %v1850_v47 = vrot.slane %v2833_v50, %v2797_v9  ;;  %v1530_v9 = vsel %vm1363_vm10, %v1529_v39, %v1525_v42  ;;  %v1846_v50 = vsel %vm1363_vm10, %v1845_v6, %v1841_v22 }
 0x18e   :  { %v1935_v43 = vsel %vm1377_vm12, %v1934_v57, %v1930_v15 }
 0x18f   :  { %v2842_v62 = vpop.xlane.xlu1 %911  ;;  %v1851_v14 = vsel %vm1370_vm11, %v1850_v47, %v1846_v50 }
 0x190   :  { %v852_v58 = vpop.xlane.xlu0 %851  ;;  %v1539_v3 = vrot.slane %v2842_v62, %v2800_v19 }
 0x191   :  { %v1390_v60 = vrot.slane %v852_v58, %v2808_v13 }
 0x193   :  { %v980_v18 = vpop.xlane.xlu1 %979  ;;  %v1392_v35 = vsel %vm1391_vm14, %v1390_v60, %v1385_v24  ;;  %v1145_v24 = vstv %s1144_s1 }
 0x194   :  { %v946_v23 = vpop.xlane.xlu0 %945  ;;  %v1707_v10 = vrot.slane %v980_v18, %v2808_v13 }
 0x195   :  { %v1623_v28 = vrot.slane %v946_v23, %v2803_v20 }
 0x196   :  { %v1708_v32 = vsel %vm1391_vm14, %v1707_v10, %v1703_v25 }
 0x197   :  { %v1074_v27 = vpop.xlane.xlu1 %1073  ;;  %v1947_v34 = vsel %vm1946_vm15, %v1708_v32, %v1392_v35  ;;  %v1624_v31 = vsel %vm1384_vm13, %v1623_v28, %v1619_v46  ;;  %v1149_v35 = vstv %s2113_s7 }
 0x198   :  { %v1040_v33 = vpop.xlane.xlu0 %1039  ;;  %2020 = vmatmul.mubr.f32.vlgmr.msra.gmra.mxu0 %v1947_v34  ;;  %v1939_v44 = vrot.slane %v1074_v27, %v2803_v20 }
 0x199   :  { %v1855_v17 = vrot.slane %v1040_v33, %v2800_v19  ;;  %v1535_v19 = vsel %vm1370_vm11, %v1534_v56, %v1530_v9 }
 0x19a   :  { %v1940_v59 = vsel %vm1384_vm13, %v1939_v44, %v1935_v43  ;;  %v1540_v16 = vsel %vm1377_vm12, %v1539_v3, %v1535_v19 }
 0x19b   :  { %v948_v37 = vpop.xlane.xlu1 %947  ;;  %v1856_v52 = vsel %vm1377_vm12, %v1855_v17, %v1851_v14 }
 0x19c   :  { %v914_v41 = vpop.xlane.xlu0 %913  ;;  %v1628_v51 = vrot.slane %v948_v37, %v2808_v13 }
 0x19d   :  { %v1544_v54 = vrot.slane %v914_v41, %v2803_v20 }
 0x19e   :  { %v1629_v58 = vsel %vm1391_vm14, %v1628_v51, %v1624_v31 }
 0x19f   :  { %v1076_v21 = vpop.xlane.xlu1 %1075  ;;  %v1545_v49 = vsel %vm1384_vm13, %v1544_v54, %v1540_v16 }
 0x1a0   :  { %v1042_v48 = vpop.xlane.xlu0 %1041  ;;  %v1944_v11 = vrot.slane %v1076_v21, %v2808_v13 }
 0x1a1   :  { %v1860_v55 = vrot.slane %v1042_v48, %v2803_v20 }
 0x1a2   :  { %v1945_v62 = vsel %vm1391_vm14, %v1944_v11, %v1940_v59 }
 0x1a3   :  { %v1044_v63 = vpop.xlane.xlu1 %1043  ;;  %v1950_v20 = vsel %vm1946_vm15, %v1945_v62, %v1629_v58  ;;  %v1861_v18 = vsel %vm1384_vm13, %v1860_v55, %v1856_v52 }
 0x1a4   :  { %v916_v12 = vpop.xlane.xlu0 %915  ;;  %v1865_v60 = vrot.slane %v1044_v63, %v2808_v13  ;;  %2089 = vmatprep.mubr.f32.mxu1 %v1950_v20 }
 0x1a5   :  { %v1549_v0 = vrot.slane %v916_v12, %v2808_v13  ;;  %v1146_v13 = vsel %vm1143_vm0, %v1145_v24, 0.0 }
 0x1a6   :  { %v1866_v2 = vsel %vm1391_vm14, %v1865_v60, %v1861_v18  ;;  %v1150_v27 = vsel %vm1147_vm1, %v1149_v35, %v1146_v13 }
 0x1a7   :  { %v1550_v23 = vsel %vm1391_vm14, %v1549_v0, %v1545_v49 }
 0x1a8   :  { %v1949_v7 = vsel %vm1946_vm15, %v1866_v2, %v1550_v23 }
 0x1a9   :  { %2090 = vmatmul.mubr.f32.vlgmr.msra.gmra.mxu1 %v1949_v7 }
 0x258   :  { %v2146_v10 = vpop.f32.mrf.mxu0 }
 0x25a   :  { %v2147_v25 = vpop.f32.mrf.mxu0 }
 0x25b   :  { %v2148_v32 = vadd.f32 %v2147_v25, %v2146_v10 }
 0x25d   :  { %v2022_v26 = vadd.f32 %v2148_v32, %v1150_v27 }
 0x269   :  { %v2181_v33 = vpop.f32.mrf.mxu1 }
 0x26b   :  { %v2182_v34 = vpop.f32.mrf.mxu1 }
 0x26c   :  { %v2183_v8 = vadd.f32 %v2182_v34, %v2181_v33 }
 0x26e   :  { %v2092_v36 = vadd.f32 %v2183_v8, %v2022_v26 }
 0x270   :  { %2096 = vst.msk [vmem:[#allocation8] sm:$0x3] %vm2095_vm2, %v2092_v36 }
 0x271   :  { %2232 = shalt.err (!%p2229_p0)
}
 0x272   :  { %2106 = dma.vmem_to_hbm [thread:$0]  %s2104_s9, 32, %s2936_s3, [#allocation5]  }
 0x273   :  { %2245 = dma.done.wait [#allocation5], 32  }
 0x274   :  { %2246 = vsyncadd [#allocation5], 4294967264 }
 0x275   :  { %2110 = vsyncpa [#allocation4], 1 }
 0x276   :  { %2111 = vsyncpa [#allocation5], 1 }
 0x277   :  { %2112 = vsyncpa [#allocation6], 1 }

</bundles_post_ra>
